<compile_context>
chip_gen: v7x
topology: tpu7x:2x2x1
jax: 0.10.0
libtpu: 0.0.40
codegen_flags: <defaults>
</compile_context>

<pallas_src>
import functools

import jax
import jax.numpy as jnp
from jax import lax
from jax.experimental import pallas as pl
from jax.experimental.pallas import tpu as pltpu


def _poisson_kernel(x_ref, w_ref, b0_ref, o_ref):
    # x_ref : (tile_n, D)  VMEM  -- streaming row tile of x
    # w_ref : (1, D)       VMEM  -- weight row (constant index_map -> resident)
    # b0_ref: (1, 1)       SMEM  -- intercept scalar
    # o_ref : (1, tile_n)  VMEM  -- lane-dense output row
    #
    # eta[0, r] = sum_d w[0, d] * x[r, d]  == (x @ beta[1:]) laid out along
    # lanes.  Contracting both last dims gives the result directly in a
    # lane-dense (1, tile_n) layout -> no in-kernel transpose/reshape.
    eta = lax.dot_general(
        w_ref[...], x_ref[...],
        dimension_numbers=(((1,), (1,)), ((), ())),
        preferred_element_type=jnp.float32,
    )
    eta = eta + b0_ref[0, 0]
    o_ref[...] = jnp.exp(eta).astype(o_ref.dtype)


def _round_up(a, b):
    return -(-a // b) * b


def _choose_tile_n(n, d):
    """Row-tile size: big enough to hide per-step overhead, VMEM-safe on v7x."""
    # In VMEM the x tile's last dim pads up to a multiple of 128 lanes.
    d_lanes = max(128, _round_up(d, 128))
    vmem_bytes_per_row = d_lanes * 4  # f32
    # ~8 MiB per x buffer -> 2 (double-buffer) x 8 MiB + tiny w/out buffers
    # stays well inside the 32 MiB scoped-VMEM budget requested below
    # (v7x-safe: 64 MiB physical, 32 MiB scoped default).
    budget = 8 * 1024 * 1024
    tile = max(128, (budget // vmem_bytes_per_row) // 128 * 128)
    # Prefer >= 2 grid steps whenever N allows it: multi-step grids let the
    # BlockSpec pipeline overlap the HBM->VMEM DMA of x with compute, and the
    # parallel batch axis can be sharded across TensorCores.
    half = max(128, _round_up(-(-n // 2), 128))
    return min(tile, half)


@functools.partial(jax.jit, static_argnames=("tile_n",))
def poisson_regression_forward(x, beta, *, tile_n=None):
    """exp([ones, x] @ beta) -- equivalent to PoissonRegression.forward.

    x:    (N, D) float32
    beta: (D+1, 1) float32
    returns (N, 1) float32
    """
    n, d = x.shape
    assert beta.shape == (d + 1, 1)

    b0 = beta[0:1, :]                  # (1, 1) intercept -> SMEM scalar
    w_row = beta[1:, :].reshape(1, d)  # (1, D) weight row, lane-dense

    if tile_n is None:
        tile_n = _choose_tile_n(n, d)
    # Multiple of 128 satisfies the sublane constraint on the x tile and makes
    # the (1, tile_n) output block lane-dense (unmasked stores).
    assert tile_n % 128 == 0, "tile_n must be a multiple of 128"

    if n < tile_n:
        # Tiny batch: pad rows up to a single tile (cheap) instead of using a
        # block larger than the array.  Padded rows produce exp(b0) (finite)
        # and are sliced off below.
        n_eff = tile_n
        x = jnp.pad(x, ((0, tile_n - n), (0, 0)))
    else:
        # Large batch: no padded HBM copy of x.  The grid uses cdiv and Pallas
        # handles the partial last block; out-of-range rows only influence
        # output lanes that are masked out on write-back.
        n_eff = n

    num_tiles = pl.cdiv(n_eff, tile_n)

    out = pl.pallas_call(
        _poisson_kernel,
        out_shape=jax.ShapeDtypeStruct((1, n_eff), jnp.float32),
        grid_spec=pltpu.PrefetchScalarGridSpec(
            num_scalar_prefetch=0,
            grid=(num_tiles,),
            in_specs=[
                # streaming x row tile (double-buffered by the pipeline)
                pl.BlockSpec((tile_n, d), lambda i: (i, 0)),
                # weight row: constant index_map -> stays resident in VMEM
                pl.BlockSpec((1, d), lambda i: (0, 0)),
                # intercept scalar in SMEM
                pl.BlockSpec(memory_space=pltpu.MemorySpace.SMEM),
            ],
            out_specs=pl.BlockSpec((1, tile_n), lambda i: (0, i)),
        ),
        compiler_params=pltpu.CompilerParams(
            dimension_semantics=("parallel",),   # batch tiles are independent
            vmem_limit_bytes=32 * 1024 * 1024,   # safe on v5e/v6e/v7x
        ),
    )(x, w_row, b0)

    # TODO(synk): for extremely large D the (tile_n, D) tile would need a
    # K-tiled accumulation loop; D here is the module's small feature dim.

    # Free layout change on a contiguous (1, N) slab back to the module's (N, 1).
    return out[0, :n].reshape(n, 1)


def poisson_regression_reference(x, beta):
    ones = jnp.ones((x.shape[0], 1), dtype=x.dtype)
    x_with_intercept = jnp.concatenate([ones, x], axis=1)
    eta = jnp.dot(x_with_intercept, beta, precision=jax.lax.Precision.HIGHEST)
    return jnp.exp(eta)


if __name__ == "__main__":
    key = jax.random.PRNGKey(0)
    k_x, k_beta, k_x2 = jax.random.split(key, 3)

    # Small shapes consistent with the module: batch=8, features=32.
    N, D = 8, 32
    x = jax.random.normal(k_x, (N, D), dtype=jnp.float32)
    beta = jax.random.normal(k_beta, (D + 1, 1), dtype=jnp.float32)

    out = jax.block_until_ready(poisson_regression_forward(x, beta))
    ref = poisson_regression_reference(x, beta)
    assert out.shape == (N, 1)
    assert jnp.allclose(out, ref, rtol=1e-4, atol=1e-5), (
        f"max abs err {jnp.max(jnp.abs(out - ref))}"
    )

    # Second check: multi-step grid with a partial last block (no HBM padding).
    N2 = 300
    x2 = jax.random.normal(k_x2, (N2, D), dtype=jnp.float32) * 0.1
    out2 = jax.block_until_ready(
        poisson_regression_forward(x2, beta, tile_n=128)
    )
    ref2 = poisson_regression_reference(x2, beta)
    assert out2.shape == (N2, 1)
    assert jnp.allclose(out2, ref2, rtol=1e-4, atol=1e-5), (
        f"max abs err {jnp.max(jnp.abs(out2 - ref2))}"
    )

    print("KERNEL_OK")
</pallas_src>

<mosaic_0001>
module attributes {stable_mosaic.version = 11 : i64} {
  func.func @_poisson_kernel(%arg0: i32, %arg1: memref<128x32xf32, #tpu.memory_space<vmem>>, %arg2: memref<1x32xf32, #tpu.memory_space<vmem>>, %arg3: memref<1x1xf32, #tpu.memory_space<smem>>, %arg4: memref<1x128xf32, #tpu.memory_space<vmem>>) attributes {dimension_semantics = [#tpu.dimension_semantics<parallel>], iteration_bounds = array<i64: 1>, scalar_prefetch = 0 : i64, scratch_operands = 0 : i64, tpu.core_type = #tpu.core_type<tc>, window_params = [{transform_indices = @transform_0, window_bounds = array<i64: 128, 32>}, {pipeline_mode = #tpu.pipeline_mode<synchronous>, transform_indices = @transform_1, window_bounds = array<i64: 1, 32>}, {transform_indices = @transform_2, window_bounds = array<i64: 1, 1>}, {transform_indices = @transform_3, window_bounds = array<i64: 1, 128>}]} {
    %c0 = arith.constant 0 : index
    %c0_0 = arith.constant 0 : index
    %0 = vector.load %arg2[%c0, %c0_0] : memref<1x32xf32, #tpu.memory_space<vmem>>, vector<1x32xf32>
    %c0_1 = arith.constant 0 : index
    %c0_2 = arith.constant 0 : index
    %1 = vector.load %arg1[%c0_1, %c0_2] : memref<128x32xf32, #tpu.memory_space<vmem>>, vector<128x32xf32>
    %cst = arith.constant dense<0.000000e+00> : vector<1x128xf32>
    %2 = tpu.matmul %0, %1, %cst {dimension_numbers = #tpu.dot_dimension_numbers<[1], [1], [0], [0], [0, 0, 1, 0], [], []>} : vector<1x32xf32>, vector<128x32xf32>, vector<1x128xf32> -> vector<1x128xf32>
    %c0_3 = arith.constant 0 : index
    %c0_4 = arith.constant 0 : index
    %3 = memref.load %arg3[%c0_3, %c0_4] : memref<1x1xf32, #tpu.memory_space<smem>>
    %4 = vector.broadcast %3 : f32 to vector<1x128xf32>
    %5 = arith.addf %2, %4 : vector<1x128xf32>
    %6 = math.exp %5 : vector<1x128xf32>
    %c0_5 = arith.constant 0 : index
    %c0_6 = arith.constant 0 : index
    %7 = vector.load %arg4[%c0_5, %c0_6] : memref<1x128xf32, #tpu.memory_space<vmem>>, vector<1x128xf32>
    tpu.vector_store %arg4[%c0_5, %c0_6], %6 {strides = array<i32>} : memref<1x128xf32, #tpu.memory_space<vmem>>, vector<1x128xf32>,
    return
  }
  func.func @transform_0(%arg0: i32) -> (i32, i32) {
    %c0_i32 = arith.constant 0 : i32
    %c0_i32_0 = arith.constant 0 : i32
    return %arg0, %c0_i32 : i32, i32
  }
  func.func @transform_1(%arg0: i32) -> (i32, i32) {
    %c0_i32 = arith.constant 0 : i32
    %c0_i32_0 = arith.constant 0 : i32
    %c0_i32_1 = arith.constant 0 : i32
    return %c0_i32, %c0_i32_0 : i32, i32
  }
  func.func @transform_2(%arg0: i32) -> (i32, i32) {
    %c0_i32 = arith.constant 0 : i32
    %c0_i32_0 = arith.constant 0 : i32
    %c0_i32_1 = arith.constant 0 : i32
    return %c0_i32, %c0_i32_0 : i32, i32
  }
  func.func @transform_3(%arg0: i32) -> (i32, i32) {
    %c0_i32 = arith.constant 0 : i32
    %c0_i32_0 = arith.constant 0 : i32
    return %c0_i32, %arg0 : i32, i32
  }
}

</mosaic_0001>

<bundles_post_ra>
// kernel: poisson_regression_forward.1
= control target key start
LH: loop header
LB: loop body
LE: loop exit
PB: predicated region body
PF: predicated region fallthrough
CT: control target
= control target key end

     0   :  { %vm34_vm0 = vcmask 261120   ;;  %v269_v0 = vmov 0.0|0.0   ;;  %vm270_vm2 = vmmov 0   ;;  %v271_v4 = vmov 0.0   ;;  %s372_s0 = inlined_call_operand.vmem [shape: f32[128,32], index: 0, kind: input, shape index: {}]   ;;  %s373_s1 = inlined_call_operand.vmem [shape: f32[1,32], index: 1, kind: input, shape index: {}]   ;;  %s374_s2 = inlined_call_operand.<no memory space> [shape: f32[1,1], index: 2, kind: input, shape index: {}]   ;;  %s375_s3 = inlined_call_operand.vmem [shape: f32[1,128], index: 3, kind: output, shape index: {}]  }
   0x1   :  { %232 = vmatprep.subr.bf16.mxu0 %v269_v0  ;;  %v16_v1 = vld [vmem:[%s372_s0] sm:$0xff]  ;;  %v17_v2 = vld [vmem:[%s372_s0 + $0x8] sm:$0xff]  ;;  %vm300_vm1 = vmpackc.low %vm34_vm0, %vm34_vm0  ;;  %229 = vmatprep.mubr.msk.f32.mxu0 %vm270_vm2, %v271_v4  ;;  %v33_v28 = vstv %s374_s2 }
   0x2   :  { %v233_v5 = vpack.c.bf16 %v17_v2, %v16_v1  ;;  %v18_v6 = vld [vmem:[%s372_s0 + $0x10] sm:$0xff]  ;;  %v19_v7 = vld [vmem:[%s372_s0 + $0x18] sm:$0xff]  ;;  %v20_v9 = vld [vmem:[%s372_s0 + $0x20] sm:$0xff] }
   0x3   :  { %v237_v8 = vpack.c.bf16 %v19_v7, %v18_v6  ;;  %v21_v10 = vld [vmem:[%s372_s0 + $0x28] sm:$0xff]  ;;  %v22_v12 = vld [vmem:[%s372_s0 + $0x30] sm:$0xff]  ;;  %v23_v13 = vld [vmem:[%s372_s0 + $0x38] sm:$0xff] }
   0x4   :  { %235 = vmatpush3.bf16.xpose.msk.msra.mxu0 %vm300_vm1, %v233_v5  ;;  %v241_v11 = vpack.c.bf16 %v21_v10, %v20_v9  ;;  %v245_v14 = vpack.c.bf16 %v23_v13, %v22_v12  ;;  %v24_v15 = vld [vmem:[%s372_s0 + $0x40] sm:$0xff]  ;;  %v25_v16 = vld [vmem:[%s372_s0 + $0x48] sm:$0xff]  ;;  %v26_v18 = vld [vmem:[%s372_s0 + $0x50] sm:$0xff] }
   0x5   :  { %236 = vmatprep.subr.bf16.mxu0 %v269_v0  ;;  %v249_v17 = vpack.c.bf16 %v25_v16, %v24_v15  ;;  %v27_v19 = vld [vmem:[%s372_s0 + $0x58] sm:$0xff]  ;;  %v28_v21 = vld [vmem:[%s372_s0 + $0x60] sm:$0xff]  ;;  %v29_v22 = vld [vmem:[%s372_s0 + $0x68] sm:$0xff] }
   0x6   :  { %v253_v20 = vpack.c.bf16 %v27_v19, %v26_v18  ;;  %v257_v23 = vpack.c.bf16 %v29_v22, %v28_v21  ;;  %v30_v24 = vld [vmem:[%s372_s0 + $0x70] sm:$0xff]  ;;  %v31_v25 = vld [vmem:[%s372_s0 + $0x78] sm:$0xff]  ;;  %v15_v27 = vld [vmem:[%s373_s1] sm:$0x1] }
   0x7   :  { %v261_v26 = vpack.c.bf16 %v31_v25, %v30_v24 }
   0xc   :  { %239 = vmatpush3.bf16.xpose.msk.msra.mxu0 %vm300_vm1, %v237_v8 }
   0xd   :  { %240 = vmatprep.subr.bf16.mxu0 %v269_v0 }
  0x14   :  { %243 = vmatpush3.bf16.xpose.msk.msra.mxu0 %vm300_vm1, %v241_v11 }
  0x15   :  { %244 = vmatprep.subr.bf16.mxu0 %v269_v0 }
  0x1c   :  { %247 = vmatpush3.bf16.xpose.msk.msra.mxu0 %vm300_vm1, %v245_v14 }
  0x1d   :  { %248 = vmatprep.subr.bf16.mxu0 %v269_v0 }
  0x24   :  { %251 = vmatpush3.bf16.xpose.msk.msra.mxu0 %vm300_vm1, %v249_v17 }
  0x25   :  { %252 = vmatprep.subr.bf16.mxu0 %v269_v0 }
  0x2c   :  { %255 = vmatpush3.bf16.xpose.msk.msra.mxu0 %vm300_vm1, %v253_v20 }
  0x2d   :  { %256 = vmatprep.subr.bf16.mxu0 %v269_v0 }
  0x34   :  { %259 = vmatpush3.bf16.xpose.msk.msra.mxu0 %vm300_vm1, %v257_v23 }
  0x35   :  { %260 = vmatprep.subr.bf16.mxu0 %v269_v0 }
  0x3c   :  { %263 = vmatpush3.bf16.xpose.msk.msra.mxu0 %vm300_vm1, %v261_v26 }
  0x43   :  { %230 = vmatmul.mubr.msk.f32.vlgmr.msra.gmra.mrb[0].mxu0 %vm34_vm0, %v15_v27 }
 0x116   :  { %v152_v29 = vpop.f32.mrb[0].mxu0 }
 0x117   :  { %v153_v30 = vadd.f32 %v152_v29, %v33_v28  ;;  %v231_v31 = vpop.f32.mrb[1].mxu0 }
 0x119   :  { %v156_v32 = vmul.f32 1.442695, %v153_v30 }
 0x11b   :  { %267 = vpow2.f32 %v156_v32 }
 0x125   :  { %v268_v33 = vpop.eup %267 }
 0x126   :  { %158 = vst [vmem:[%s375_s3] sm:$0x1] %v268_v33 }

</bundles_post_ra>
